<compile_context>
chip_gen: v7x
topology: tpu7x:2x2x1
jax: 0.10.0
libtpu: 0.0.40
codegen_flags: <defaults>
</compile_context>

<pallas_src>
import math

import jax
import jax.numpy as jnp
from jax import lax
from jax.experimental import pallas as pl
from jax.experimental.pallas import tpu as pltpu


def _round_up(n, m):
    return ((n + m - 1) // m) * m


def _cdiv(a, b):
    return (a + b - 1) // b


def mlp_kernel(x_ref, w1_ref, b1_ref, w2_ref, b2_ref, w3_ref, b3_ref, o_ref):
    """One batch tile. Shapes per tile:
       x [TB, D] (native dtype), w1 [H, D] (x.dtype), b1 [H, 1], w2 [H, H], b2 [H, 1],
       w3 [H, 1], b3 [1, 1], o [1, TB]   (H = 7)."""
    x = x_ref[...]  # [TB, D] — no upcast; MXU accumulates in f32 below.

    # Layer 1 on the MXU: contract over D with the batch tile un-transposed.
    # [H, D] x [TB, D]^T -> [H, TB]; Mosaic handles the transposed RHS on-chip.
    z1 = lax.dot_general(
        w1_ref[...], x,
        dimension_numbers=(((1,), (1,)), ((), ())),
        preferred_element_type=jnp.float32,
    )
    h1 = jnp.tanh(z1 + b1_ref[...])                                   # [H, TB] f32

    # Layer 2 on the MXU, batch stays on lanes.
    h2 = jnp.tanh(
        jnp.dot(w2_ref[...], h1, preferred_element_type=jnp.float32) + b2_ref[...]
    )                                                                  # [H, TB] f32

    # Layer 3 (7 -> 1): VPU broadcast-multiply + sublane reduce.
    z3 = jnp.sum(w3_ref[...] * h2, axis=0, keepdims=True) + b3_ref[...]  # [1, TB]
    o_ref[...] = jax.nn.sigmoid(z3).astype(o_ref.dtype)                  # lane-dense store


def logistic_regression_forward(x, params, *, vmem_budget_bytes=8 << 20,
                                max_block_batch=None):
    """x: [B, D] (float32 or bfloat16). params: w1 [D,7], b1 [1,7], w2 [7,7], b2 [1,7],
    w3 [7,1], b3 [1,1] (weights stored [in_features, out_features], i.e. transpose of
    PyTorch's [out, in]).  Returns sigmoid(tanh(tanh(x@w1+b1)@w2+b2)@w3+b3) : [B, 1] f32.

    vmem_budget_bytes: target VMEM footprint of ONE x tile buffer (it is double-buffered by
      the Pallas pipeline). The [TB, D] tile is lane-padded to 128 in VMEM, so
      TB ~= budget / (round_up(D,128) * itemsize).
    max_block_batch: optional cap on TB (testing / tuning).
    """
    B, D = x.shape
    w1, b1 = params["w1"], params["b1"]
    w2, b2 = params["w2"], params["b2"]
    w3, b3 = params["w3"], params["b3"]
    H = w1.shape[1]            # 7
    assert w1.shape[0] == D
    assert w3.shape[1] == 1, "layer-3 sublane-reduce head assumes a single output unit"

    # ---- VMEM-aware batch-tile size (accounts for lane padding of the [TB, D] tile) ----
    itemsize = jnp.dtype(x.dtype).itemsize
    lane_row_bytes = _round_up(D, 128) * itemsize
    tb_cap = max(128, (vmem_budget_bytes // lane_row_bytes) // 128 * 128)
    if max_block_batch is not None:
        tb_cap = min(tb_cap, max(128, _round_up(max_block_batch, 128)))

    # Balanced tiles (tail waste < ~128 rows/tile); >= 2 even tiles for v7x 2-TC sharding.
    num_tiles = _cdiv(B, tb_cap)
    if B >= 1024:
        num_tiles = max(num_tiles, 2)
        num_tiles += num_tiles % 2
    tb = min(tb_cap, _round_up(_cdiv(B, num_tiles), 128))
    grid = (_cdiv(B, tb),)      # Pallas masks the partial final block; no explicit padding.

    x_tile_vmem = tb * _round_up(D, 128) * itemsize
    vmem_limit = int(min(48 << 20, max(32 << 20, 4 * x_tile_vmem)))

    # ---- Tiny weight/bias prep (no large host-side data movement) ----
    w1T = w1.T.astype(x.dtype)              # [H, D] in x's dtype -> native MXU path
    b1T = b1.T.astype(jnp.float32)          # [H, 1]
    w2T = w2.T.astype(jnp.float32)          # [H, H]
    b2T = b2.T.astype(jnp.float32)          # [H, 1]
    w3f = w3.astype(jnp.float32)            # [H, 1]
    b3T = b3.T.astype(jnp.float32)          # [1, 1]

    full = lambda shape: pl.BlockSpec(shape, lambda i: (0, 0))

    out = pl.pallas_call(
        mlp_kernel,
        out_shape=jax.ShapeDtypeStruct((1, B), jnp.float32),
        grid=grid,
        in_specs=[
            pl.BlockSpec((tb, D), lambda i: (i, 0)),   # x tile: pipelined / double-buffered
            full((H, D)), full((H, 1)),
            full((H, H)), full((H, 1)),
            full((H, 1)), full((1, 1)),
        ],
        out_specs=pl.BlockSpec((1, tb), lambda i: (0, i)),   # lane-dense [1, TB] output tile
        compiler_params=pltpu.CompilerParams(
            dimension_semantics=("parallel",),   # shard batch tiles across TCs on v7x
            vmem_limit_bytes=vmem_limit,
        ),
    )(x, w1T, b1T, w2T, b2T, w3f, b3T)

    return out.reshape(B, 1)   # [1, B] -> [B, 1]; trivial vs. x traffic


def init_params(key, input_size):
    """Deterministic init mirroring PyTorch nn.Linear defaults (U(-1/sqrt(fan_in), 1/sqrt(fan_in)))."""
    hidden = 7
    out = 1
    ks = jax.random.split(key, 6)

    def linear(kw, kb, fan_in, fan_out):
        bound = 1.0 / math.sqrt(fan_in)
        w = jax.random.uniform(kw, (fan_in, fan_out), jnp.float32, -bound, bound)
        b = jax.random.uniform(kb, (1, fan_out), jnp.float32, -bound, bound)
        return w, b

    w1, b1 = linear(ks[0], ks[1], input_size, hidden)
    w2, b2 = linear(ks[2], ks[3], hidden, hidden)
    w3, b3 = linear(ks[4], ks[5], hidden, out)
    return {"w1": w1, "b1": b1, "w2": w2, "b2": b2, "w3": w3, "b3": b3}


def reference_forward(x, p):
    h1 = jnp.tanh(x @ p["w1"] + p["b1"])
    h2 = jnp.tanh(h1 @ p["w2"] + p["b2"])
    return jax.nn.sigmoid(h2 @ p["w3"] + p["b3"])


if __name__ == "__main__":
    key = jax.random.PRNGKey(0)
    k_x, k_p = jax.random.split(key)

    input_size = 16
    params = init_params(k_p, input_size)

    # Case 1: B=8 like the original script (single partial tile, no padding needed).
    # Case 2: B=300 with TB forced to 128 -> 3 grid steps incl. a masked partial final
    #         block, exercising the pipelined batch grid and the tail path.
    for batch, tb_override in ((8, None), (300, 128)):
        x = jax.random.normal(jax.random.fold_in(k_x, batch), (batch, input_size), jnp.float32)
        x = x - jnp.mean(x, axis=0, keepdims=True)   # mimic the script's "x = x - np.mean(x, 0)"

        out = jax.block_until_ready(
            logistic_regression_forward(x, params, max_block_batch=tb_override))
        ref = reference_forward(x, params)

        assert out.shape == (batch, 1)
        assert jnp.allclose(out, ref, atol=1e-5, rtol=1e-5), (
            f"mismatch at batch={batch}: max err {jnp.max(jnp.abs(out - ref))}")

    print("KERNEL_OK")
</pallas_src>

<mosaic_0001>
module attributes {stable_mosaic.version = 11 : i64} {
  func.func @mlp_kernel(%arg0: i32, %arg1: memref<128x16xf32, #tpu.memory_space<vmem>>, %arg2: memref<7x16xf32, #tpu.memory_space<vmem>>, %arg3: memref<7x1xf32, #tpu.memory_space<vmem>>, %arg4: memref<7x7xf32, #tpu.memory_space<vmem>>, %arg5: memref<7x1xf32, #tpu.memory_space<vmem>>, %arg6: memref<7x1xf32, #tpu.memory_space<vmem>>, %arg7: memref<1x1xf32, #tpu.memory_space<vmem>>, %arg8: memref<1x128xf32, #tpu.memory_space<vmem>>) attributes {dimension_semantics = [#tpu.dimension_semantics<parallel>], iteration_bounds = array<i64: 1>, scalar_prefetch = 0 : i64, scratch_operands = 0 : i64, tpu.core_type = #tpu.core_type<tc>, window_params = [{transform_indices = @transform_0, window_bounds = array<i64: 128, 16>}, {pipeline_mode = #tpu.pipeline_mode<synchronous>, transform_indices = @transform_1, window_bounds = array<i64: 7, 16>}, {pipeline_mode = #tpu.pipeline_mode<synchronous>, transform_indices = @transform_2, window_bounds = array<i64: 7, 1>}, {pipeline_mode = #tpu.pipeline_mode<synchronous>, transform_indices = @transform_3, window_bounds = array<i64: 7, 7>}, {pipeline_mode = #tpu.pipeline_mode<synchronous>, transform_indices = @transform_4, window_bounds = array<i64: 7, 1>}, {pipeline_mode = #tpu.pipeline_mode<synchronous>, transform_indices = @transform_5, window_bounds = array<i64: 7, 1>}, {pipeline_mode = #tpu.pipeline_mode<synchronous>, transform_indices = @transform_6, window_bounds = array<i64: 1, 1>}, {transform_indices = @transform_7, window_bounds = array<i64: 1, 128>}]} {
    %c0 = arith.constant 0 : index
    %c0_0 = arith.constant 0 : index
    %0 = vector.load %arg1[%c0, %c0_0] : memref<128x16xf32, #tpu.memory_space<vmem>>, vector<128x16xf32>
    %c0_1 = arith.constant 0 : index
    %c0_2 = arith.constant 0 : index
    %1 = vector.load %arg2[%c0_1, %c0_2] : memref<7x16xf32, #tpu.memory_space<vmem>>, vector<7x16xf32>
    %cst = arith.constant dense<0.000000e+00> : vector<7x128xf32>
    %2 = tpu.matmul %1, %0, %cst {dimension_numbers = #tpu.dot_dimension_numbers<[1], [1], [0], [0], [0, 0, 1, 0], [], []>} : vector<7x16xf32>, vector<128x16xf32>, vector<7x128xf32> -> vector<7x128xf32>
    %c0_3 = arith.constant 0 : index
    %c0_4 = arith.constant 0 : index
    %3 = vector.load %arg3[%c0_3, %c0_4] : memref<7x1xf32, #tpu.memory_space<vmem>>, vector<7x1xf32>
    %4 = vector.broadcast %3 : vector<7x1xf32> to vector<7x128xf32>
    %5 = arith.addf %2, %4 : vector<7x128xf32>
    %6 = math.tanh %5 : vector<7x128xf32>
    %c0_5 = arith.constant 0 : index
    %c0_6 = arith.constant 0 : index
    %7 = vector.load %arg4[%c0_5, %c0_6] : memref<7x7xf32, #tpu.memory_space<vmem>>, vector<7x7xf32>
    %cst_7 = arith.constant dense<0.000000e+00> : vector<7x128xf32>
    %8 = tpu.matmul %7, %6, %cst_7 {dimension_numbers = #tpu.dot_dimension_numbers<[1], [0], [0], [1], [0, 0, 1, 1], [], []>} : vector<7x7xf32>, vector<7x128xf32>, vector<7x128xf32> -> vector<7x128xf32>
    %c0_8 = arith.constant 0 : index
    %c0_9 = arith.constant 0 : index
    %9 = vector.load %arg5[%c0_8, %c0_9] : memref<7x1xf32, #tpu.memory_space<vmem>>, vector<7x1xf32>
    %10 = vector.broadcast %9 : vector<7x1xf32> to vector<7x128xf32>
    %11 = arith.addf %8, %10 : vector<7x128xf32>
    %12 = math.tanh %11 : vector<7x128xf32>
    %c0_10 = arith.constant 0 : index
    %c0_11 = arith.constant 0 : index
    %13 = vector.load %arg6[%c0_10, %c0_11] : memref<7x1xf32, #tpu.memory_space<vmem>>, vector<7x1xf32>
    %14 = vector.broadcast %13 : vector<7x1xf32> to vector<7x128xf32>
    %15 = arith.mulf %14, %12 : vector<7x128xf32>
    %cst_12 = arith.constant dense<0.000000e+00> : vector<128xf32>
    %16 = vector.multi_reduction <add>, %15, %cst_12 [0] : vector<7x128xf32> to vector<128xf32>
    %17 = vector.shape_cast %16 : vector<128xf32> to vector<1x128xf32>
    %c0_13 = arith.constant 0 : index
    %c0_14 = arith.constant 0 : index
    %18 = vector.load %arg7[%c0_13, %c0_14] : memref<1x1xf32, #tpu.memory_space<vmem>>, vector<1x1xf32>
    %19 = vector.broadcast %18 : vector<1x1xf32> to vector<1x128xf32>
    %20 = arith.addf %17, %19 : vector<1x128xf32>
    %21 = arith.negf %20 : vector<1x128xf32>
    %22 = math.exp %21 : vector<1x128xf32>
    %cst_15 = arith.constant 1.000000e+00 : f32
    %23 = vector.broadcast %cst_15 : f32 to vector<1x128xf32>
    %24 = arith.addf %23, %22 : vector<1x128xf32>
    %25 = arith.divf %23, %24 : vector<1x128xf32>
    %c0_16 = arith.constant 0 : index
    %c0_17 = arith.constant 0 : index
    %26 = vector.load %arg8[%c0_16, %c0_17] : memref<1x128xf32, #tpu.memory_space<vmem>>, vector<1x128xf32>
    tpu.vector_store %arg8[%c0_16, %c0_17], %25 {strides = array<i32>} : memref<1x128xf32, #tpu.memory_space<vmem>>, vector<1x128xf32>,
    return
  }
  func.func @transform_0(%arg0: i32) -> (i32, i32) {
    %c0_i32 = arith.constant 0 : i32
    %c0_i32_0 = arith.constant 0 : i32
    return %arg0, %c0_i32 : i32, i32
  }
  func.func @transform_1(%arg0: i32) -> (i32, i32) {
    %c0_i32 = arith.constant 0 : i32
    %c0_i32_0 = arith.constant 0 : i32
    %c0_i32_1 = arith.constant 0 : i32
    return %c0_i32, %c0_i32_0 : i32, i32
  }
  func.func @transform_2(%arg0: i32) -> (i32, i32) {
    %c0_i32 = arith.constant 0 : i32
    %c0_i32_0 = arith.constant 0 : i32
    %c0_i32_1 = arith.constant 0 : i32
    return %c0_i32, %c0_i32_0 : i32, i32
  }
  func.func @transform_3(%arg0: i32) -> (i32, i32) {
    %c0_i32 = arith.constant 0 : i32
    %c0_i32_0 = arith.constant 0 : i32
    %c0_i32_1 = arith.constant 0 : i32
    return %c0_i32, %c0_i32_0 : i32, i32
  }
  func.func @transform_4(%arg0: i32) -> (i32, i32) {
    %c0_i32 = arith.constant 0 : i32
    %c0_i32_0 = arith.constant 0 : i32
    %c0_i32_1 = arith.constant 0 : i32
    return %c0_i32, %c0_i32_0 : i32, i32
  }
  func.func @transform_5(%arg0: i32) -> (i32, i32) {
    %c0_i32 = arith.constant 0 : i32
    %c0_i32_0 = arith.constant 0 : i32
    %c0_i32_1 = arith.constant 0 : i32
    return %c0_i32, %c0_i32_0 : i32, i32
  }
  func.func @transform_6(%arg0: i32) -> (i32, i32) {
    %c0_i32 = arith.constant 0 : i32
    %c0_i32_0 = arith.constant 0 : i32
    %c0_i32_1 = arith.constant 0 : i32
    return %c0_i32, %c0_i32_0 : i32, i32
  }
  func.func @transform_7(%arg0: i32) -> (i32, i32) {
    %c0_i32 = arith.constant 0 : i32
    %c0_i32_0 = arith.constant 0 : i32
    return %c0_i32, %arg0 : i32, i32
  }
}

</mosaic_0001>

<bundles_post_ra>
// kernel: tpu_custom_call.1
= control target key start
LH: loop header
LB: loop body
LE: loop exit
PB: predicated region body
PF: predicated region fallthrough
CT: control target
= control target key end

     0   :  { %s603_s0 = inlined_call_operand.vmem [shape: f32[8,16], index: 0, kind: input, shape index: {}]   ;;  %s604_s1 = inlined_call_operand.vmem [shape: f32[7,16], index: 1, kind: input, shape index: {}]   ;;  %s605_s2 = inlined_call_operand.vmem [shape: f32[7,1], index: 2, kind: input, shape index: {}]   ;;  %s606_s3 = inlined_call_operand.vmem [shape: f32[7,7], index: 3, kind: input, shape index: {}]   ;;  %s607_s4 = inlined_call_operand.vmem [shape: f32[7,1], index: 4, kind: input, shape index: {}]   ;;  %s608_s5 = inlined_call_operand.vmem [shape: f32[7,1], index: 5, kind: input, shape index: {}]   ;;  %s609_s6 = inlined_call_operand.<no memory space> [shape: f32[1,1], index: 6, kind: input, shape index: {}]   ;;  %s610_s7 = inlined_call_operand.hbm [shape: f32[1,8], index: 7, kind: output, shape index: {}]  }
   0x1   :  { %v12_v0 = vstv %s609_s6 }
   0x2   :  { %13 = vst [vmem:[#allocation2] sm:$0x1] %v12_v0 }
   0x3   :  { %v29_v1 = vld [vmem:[%s603_s0] sm:$0xff]  ;;  %v30_v2 = vld [vmem:[%s603_s0 + $0x8] sm:$0xff]  ;;  %vm52_vm0 = vcmask 130048   ;;  %v457_v3 = vmov 0.0|0.0   ;;  %vm458_vm2 = vmmov 0   ;;  %v459_v6 = vmov 0.0  }
   0x4   :  { %386 = vmatprep.subr.bf16.mxu0 %v457_v3  ;;  %v387_v4 = vpack.c.bf16 %v30_v2, %v29_v1  ;;  %vm513_vm1 = vmpackc.low %vm52_vm0, %vm52_vm0  ;;  %378 = vmatprep.mubr.msk.f32.mxu0 %vm458_vm2, %v459_v6  ;;  %v460_v7 = vmov 0   ;;  %v31_v8 = vld [vmem:[%s603_s0 + $0x10] sm:$0xff]  ;;  %v32_v9 = vld [vmem:[%s603_s0 + $0x18] sm:$0xff] }
   0x5   :  { %423 = vset.pattern.permute.xlu0 %v460_v7  ;;  %381 = vmatprep.subr.mxu1 %v459_v6  ;;  %v46_v10 = vld [vmem:[%s605_s2] sm:$0x7f] }
   0x6   :  { %389 = vmatpush3.bf16.xpose.msk.msra.mxu0 %vm513_vm1, %v387_v4  ;;  %383 = vmatprep.mubr.msk.f32.mxu1 %vm458_vm2, %v459_v6 }
   0x7   :  { %390 = vmatprep.subr.bf16.mxu0 %v457_v3  ;;  %424 = vset.pattern.permute.xlu1 %v460_v7 }
   0x8   :  { %14 = vsyncpa [#allocation4], 0  ;;  %v391_v11 = vpack.c.bf16 %v32_v9, %v31_v8  ;;  %49 = vperm.xlu0 %423, %v46_v10   ;;  %v176_v12 = vld [vmem:[%s607_s4] sm:$0x7f]  ;;  %v34_v14 = vld [vmem:[%s603_s0 + $0x28] sm:$0xff]  ;;  %vm186_vm3 = vcmask 1046528   ;;  %v281_v47 = vlaneseq }
   0x9   :  { %v33_v13 = vld [vmem:[%s603_s0 + $0x20] sm:$0xff]  ;;  %v35_v16 = vld [vmem:[%s603_s0 + $0x30] sm:$0xff]  ;;  %v36_v17 = vld [vmem:[%s603_s0 + $0x38] sm:$0xff]  ;;  %vm182_vm4 = vcmask 56320  }
   0xa   :  { %v395_v15 = vpack.c.bf16 %v34_v14, %v33_v13  ;;  %v399_v18 = vpack.c.bf16 %v36_v17, %v35_v16  ;;  %v37_v19 = vld [vmem:[%s603_s0 + $0x40] sm:$0xff]  ;;  %v38_v20 = vld [vmem:[%s603_s0 + $0x48] sm:$0xff]  ;;  %v39_v22 = vld [vmem:[%s603_s0 + $0x50] sm:$0xff]  ;;  %v282_v51 = vshrl.u32 %v281_v47, 7 }
   0xb   :  { %v403_v21 = vpack.c.bf16 %v38_v20, %v37_v19  ;;  %v40_v23 = vld [vmem:[%s603_s0 + $0x58] sm:$0xff]  ;;  %v41_v25 = vld [vmem:[%s603_s0 + $0x60] sm:$0xff]  ;;  %v42_v26 = vld [vmem:[%s603_s0 + $0x68] sm:$0xff] }
   0xc   :  { %179 = vperm.xlu0 %423, %v176_v12   ;;  %v407_v24 = vpack.c.bf16 %v40_v23, %v39_v22  ;;  %v411_v27 = vpack.c.bf16 %v42_v26, %v41_v25  ;;  %v43_v28 = vld [vmem:[%s603_s0 + $0x70] sm:$0xff]  ;;  %v44_v29 = vld [vmem:[%s603_s0 + $0x78] sm:$0xff]  ;;  %v45_v31 = vld [vmem:[%s604_s1] sm:$0x7f]  ;;  %v283_v54 = vsub.s32 0, %v282_v51  ;;  %s461_s1 = smov [#allocation3]  }
   0xd   :  { %v415_v30 = vpack.c.bf16 %v44_v29, %v43_v28  ;;  %v261_v32 = vld [vmem:[%s608_s5] sm:$0x7f] }
   0xe   :  { %393 = vmatpush3.bf16.xpose.msk.msra.mxu0 %vm513_vm1, %v391_v11  ;;  %264 = vperm.xlu1 %424, %v261_v32   ;;  %v275_v33 = vld [vmem:[#allocation2] sm:$0x1] }
   0xf   :  { %394 = vmatprep.subr.bf16.mxu0 %v457_v3  ;;  %v175_v38 = vld [vmem:[%s606_s3] sm:$0x7f]  ;;  %s299_s3 = sshll.u32 %s461_s1, 4  ;;  %s300_s3 = int_to_ptr.vmem [resolvable:$true] %s299_s3 }
  0x10   :  { %s433_s5 = scalar_lea.vmem %s300_s3, 16  ;;  %s437_s17 = scalar_lea.vmem %s300_s3, 32 }
  0x11   :  { %p434_p0 = scmp.ne.s32.totalorder %s300_s3, %s433_s5  ;;  %p438_p1 = scmp.lt.s32.totalorder %s300_s3, %s300_s3 }
  0x12   :  { %278 = vperm.xlu1 %424, %v275_v33   ;;  %p439_p2 = scmp.lt.s32.totalorder %s437_s17, %s433_s5 }
  0x14   :  { %p440_p3 = por %p439_p2, %p438_p1 }
  0x16   :  { %397 = vmatpush3.bf16.xpose.msk.msra.mxu0 %vm513_vm1, %v395_v15  ;;  %p441_p4 = pnand %p440_p3, %p434_p0 }
  0x17   :  { %398 = vmatprep.subr.bf16.mxu0 %v457_v3 }
  0x1e   :  { %401 = vmatpush3.bf16.xpose.msk.msra.mxu0 %vm513_vm1, %v399_v18 }
  0x1f   :  { %402 = vmatprep.subr.bf16.mxu0 %v457_v3 }
  0x26   :  { %405 = vmatpush3.bf16.xpose.msk.msra.mxu0 %vm513_vm1, %v403_v21 }
  0x27   :  { %406 = vmatprep.subr.bf16.mxu0 %v457_v3 }
  0x2e   :  { %409 = vmatpush3.bf16.xpose.msk.msra.mxu0 %vm513_vm1, %v407_v24 }
  0x2f   :  { %410 = vmatprep.subr.bf16.mxu0 %v457_v3 }
  0x36   :  { %413 = vmatpush3.bf16.xpose.msk.msra.mxu0 %vm513_vm1, %v411_v27 }
  0x37   :  { %414 = vmatprep.subr.bf16.mxu0 %v457_v3 }
  0x3e   :  { %417 = vmatpush3.bf16.xpose.msk.msra.mxu0 %vm513_vm1, %v415_v30 }
  0x45   :  { %379 = vmatmul.mubr.msk.f32.vlgmr.msra.gmra.mrb[0].mxu0 %vm52_vm0, %v45_v31 }
  0x87   :  { %v50_v34 = vpop.permute.xlu0 %49 }
  0x8b   :  { %v180_v40 = vpop.permute.xlu0 %179 }
  0x8d   :  { %v265_v45 = vpop.permute.xlu1 %264 }
  0x91   :  { %v279_v55 = vpop.permute.xlu1 %278 }
  0x92   :  { %v284_v58 = vrot.slane %v279_v55, %v283_v54 }
 0x118   :  { %v170_v35 = vpop.f32.mrb[0].mxu0 }
 0x119   :  { %v171_v36 = vadd.f32 %v170_v35, %v50_v34  ;;  %v380_v37 = vpop.f32.mrb[1].mxu0 }
 0x11b   :  { %425 = vtanh.f32 %v171_v36 }
 0x125   :  { %v426_v39 = vpop.eup %425 }
 0x126   :  { %382 = vmatpush3.msk.msra.mxu1 %vm186_vm3, %v426_v39 }
 0x127   :  { %384 = vmatmul.mubr.msk.f32.vlgmr.msra.gmra.mrb[0].mxu1 %vm182_vm4, %v175_v38 }
 0x1fa   :  { %v256_v41 = vpop.f32.mrb[0].mxu1 }
 0x1fb   :  { %v257_v42 = vadd.f32 %v256_v41, %v180_v40  ;;  %v385_v43 = vpop.f32.mrb[1].mxu1 }
 0x1fd   :  { %427 = vtanh.f32 %v257_v42 }
 0x207   :  { %v428_v44 = vpop.eup %427 }
 0x208   :  { %v267_v46 = vmul.f32 %v428_v44, %v265_v45 }
 0x20a   :  { %v268_v48 = vsel %vm186_vm3, %v267_v46, 0.0 }
 0x20b   :  { %v269_v49 = vrot.slane %v268_v48, 4 }
 0x20d   :  { %v270_v50 = vadd.f32 %v269_v49, %v268_v48 }
 0x20f   :  { %v271_v52 = vrot.slane %v270_v50, 2 }
 0x211   :  { %v272_v53 = vadd.f32 %v271_v52, %v270_v50 }
 0x213   :  { %v273_v56 = vrot.slane %v272_v53, 1 }
 0x215   :  { %v274_v57 = vadd.f32 %v273_v56, %v272_v53 }
 0x217   :  { %v285_v59 = vadd.f32 %v284_v58, %v274_v57 }
 0x219   :  { %v326_v60 = vmul.f32 -1.442695, %v285_v59 }
 0x21b   :  { %429 = vpow2.f32 %v326_v60 }
 0x225   :  { %v430_v61 = vpop.eup %429 }
 0x226   :  { %v289_v62 = vadd.f32 1.0, %v430_v61 }
 0x228   :  { %431 = vrcp.f32 %v289_v62 }
 0x232   :  { %v432_v63 = vpop.eup %431 }
 0x233   :  { %292 = vst [vmem:[#allocation3] sm:$0x1] %v432_v63 }
 0x234   :  { %444 = shalt.err (!%p441_p4)
}
 0x235   :  { %s445_s18 = scalar_lea.hbm %s610_s7, 16 }
 0x236   :  { %p446_p5 = scmp.ne.s32.totalorder %s610_s7, %s445_s18  ;;  %p449_p6 = scmp.lt.u32.totalorder %s445_s18, %s610_s7 }
 0x238   :  { %p451_p7 = pnand %p449_p6, %p446_p5 }
 0x23a   :  { %454 = shalt.err (!%p451_p7)
}
 0x23b   :  { %302 = dma.vmem_to_hbm [thread:$0]  %s300_s3, 16, %s610_s7, [#allocation4]  }
 0x23c   :  { %455 = dma.done.wait [#allocation4], 16  }
 0x23d   :  { %456 = vsyncadd [#allocation4], 4294967280 }
 0x23e   :  { %306 = vsyncpa [#allocation4], 1 }

</bundles_post_ra>
